<compile_context>
chip_gen: v6e
topology: v6e:2x2x1
jax: 0.10.0
libtpu: 0.0.40
codegen_flags: <defaults>
</compile_context>

<pallas_src>
import functools

import jax
import jax.numpy as jnp
from jax.experimental import pallas as pl
from jax.experimental.pallas import tpu as pltpu


P_POW = 2          # module default; kernel specializes p == 2
BETA = 1000.0
EPS = 1e-6


def _vmem_plan():
    """Generation-aware (input_budget_bytes, vmem_limit_bytes)."""
    try:
        cap = int(pltpu.get_tpu_info().vmem_capacity_bytes)
    except Exception:
        cap = 64 * 1024 * 1024          # v7x per-core VMEM: most conservative
    budget = max(8 * 1024 * 1024, min(24 * 1024 * 1024, cap // 3))
    limit = int(min(cap, 2 * budget + (8 << 20)))
    return budget, limit


def _pick_tiles(n, c, hw, itemsize, budget):
    """Choose (tb, tc) so one (tb, tc, hw) input block is ~budget/4 bytes.

    `budget` covers the 2 inputs x 2 pipeline buffers (+ f32 accumulators in
    the batch-tiled case).  tc is either the full C (always a legal block dim)
    or a sublane-pack-aligned multiple of 8; the last channel tile may be
    partial and is masked in-kernel.
    """
    per_block = max(1, budget // 4)
    align = 8 * max(1, 4 // itemsize)          # 8 (f32) / 16 (bf16) / 32 (i8)
    sample_bytes = c * hw * itemsize

    if sample_bytes <= per_block or c <= align:
        # Full channel slab per step; tile the batch to amortize the per-step
        # overhead.  Account for the two f32 (8, hw) accumulator rows per
        # sample so the scratch can't blow the budget for tiny-C inputs.
        per_tb = 4 * sample_bytes + 2 * 8 * hw * 4
        tb = max(1, min(n, budget // per_tb))
        if n > 1:
            tb = min(tb, -(-n // 2))           # keep >=2 "parallel" steps (v7x)
        return tb, c

    # Channel-tiled reduction, one sample per batch step.
    tc = (per_block // (hw * itemsize)) // align * align
    tc = max(align, min(tc, (c // align) * align))
    return 1, tc


def _at_kernel(fm_s_ref, fm_t_ref, o_ref, am_s_acc, am_t_acc, *,
               c_total, needs_mask):
    # fm_*_ref: (TB, TC, HW) block.  am_*_acc: (TB, 8, HW) f32 accumulators.
    k = pl.program_id(1)
    nk = pl.num_programs(1)
    tb, tc, hw = fm_s_ref.shape

    @pl.when(k == 0)
    def _():
        am_s_acc[...] = jnp.zeros_like(am_s_acc)
        am_t_acc[...] = jnp.zeros_like(am_t_acc)

    s = fm_s_ref[...].astype(jnp.float32)
    t = fm_t_ref[...].astype(jnp.float32)

    if needs_mask:
        # Last channel tile may be partial: zero out-of-range channel rows.
        rem = c_total - k * tc
        ch = jax.lax.broadcasted_iota(jnp.int32, (tb, tc, hw), 1)
        valid = ch < rem
        s = jnp.where(valid, s, 0.0)
        t = jnp.where(valid, t, 0.0)

    # p=2: |x|^2 == x*x.
    ss = s * s
    tt = t * t

    if tc % 8 == 0:
        # Sublane-aligned VPU accumulation; no per-step cross-sublane reduce.
        am_s_acc[...] += jnp.sum(ss.reshape(tb, tc // 8, 8, hw), axis=1)
        am_t_acc[...] += jnp.sum(tt.reshape(tb, tc // 8, 8, hw), axis=1)
    else:
        # Only reachable when tc == C < 8 (or odd small C): single tiny tile.
        am_s_acc[:, 0:1, :] += jnp.sum(ss, axis=1, keepdims=True)
        am_t_acc[:, 0:1, :] += jnp.sum(tt, axis=1, keepdims=True)

    @pl.when(k == nk - 1)
    def _():
        # One cross-sublane reduce per batch tile.
        am_s = jnp.sum(am_s_acc[...], axis=1, keepdims=True)   # (TB, 1, HW)
        am_t = jnp.sum(am_t_acc[...], axis=1, keepdims=True)

        # Frobenius norm over the spatial map, per sample.
        norm_s = jnp.sqrt(jnp.sum(am_s * am_s, axis=2, keepdims=True))  # (TB,1,1)
        norm_t = jnp.sqrt(jnp.sum(am_t * am_t, axis=2, keepdims=True))

        inv_s = 1.0 / (norm_s + EPS)
        inv_t = 1.0 / (norm_t + EPS)

        diff = am_s * inv_s - am_t * inv_t
        o_ref[...] = jnp.sum(diff * diff, axis=2, keepdims=True)  # (TB, 1, 1)


def at_loss(fm_s, fm_t, *, vmem_budget_override=None):
    assert fm_s.shape == fm_t.shape
    n, c, h, w = fm_s.shape
    hw = h * w

    # Free metadata reshape: make the lane axis H*W-dense.
    fm_s2 = fm_s.reshape(n, c, hw)
    fm_t2 = fm_t.reshape(n, c, hw)

    itemsize = jnp.dtype(fm_s.dtype).itemsize
    budget, vmem_limit = _vmem_plan()
    if vmem_budget_override is not None:
        budget = vmem_budget_override
    tb, tc = _pick_tiles(n, c, hw, itemsize, budget)

    nb = -(-n // tb)
    nk = -(-c // tc)
    needs_mask = (c % tc) != 0

    kernel = functools.partial(_at_kernel, c_total=c, needs_mask=needs_mask)

    partials = pl.pallas_call(
        kernel,
        out_shape=jax.ShapeDtypeStruct((n, 1, 1), jnp.float32),
        grid_spec=pltpu.PrefetchScalarGridSpec(
            num_scalar_prefetch=0,
            grid=(nb, nk),
            in_specs=[
                pl.BlockSpec((tb, tc, hw), lambda i, k: (i, k, 0)),
                pl.BlockSpec((tb, tc, hw), lambda i, k: (i, k, 0)),
            ],
            out_specs=pl.BlockSpec((tb, 1, 1), lambda i, k: (i, 0, 0)),
            scratch_shapes=[
                pltpu.VMEM((tb, 8, hw), jnp.float32),
                pltpu.VMEM((tb, 8, hw), jnp.float32),
            ],
        ),
        compiler_params=pltpu.CompilerParams(
            dimension_semantics=("parallel", "arbitrary"),
            vmem_limit_bytes=int(vmem_limit),
        ),
    )(fm_s2, fm_t2)

    # MSE over all (N, 1, H, W) elements, scaled by beta.
    return (BETA / (n * hw)) * jnp.sum(partials)


def _at_loss_ref(fm_s, fm_t):
    def attention_map(fm):
        am = jnp.sum(jnp.abs(fm) ** P_POW, axis=1, keepdims=True)
        norm = jnp.sqrt(jnp.sum(am * am, axis=(2, 3), keepdims=True))
        return am / (norm + EPS)

    return BETA * jnp.mean((attention_map(fm_s) - attention_map(fm_t)) ** 2)


if __name__ == "__main__":
    key = jax.random.PRNGKey(0)

    # Case 1: small NCHW feature maps (single channel tile, C < 8 path).
    k_s, k_t, key = jax.random.split(key, 3)
    fm_s = jax.random.normal(k_s, (2, 4, 16, 16), dtype=jnp.float32)
    fm_t = jax.random.normal(k_t, (2, 4, 16, 16), dtype=jnp.float32)
    loss = jax.block_until_ready(at_loss(fm_s, fm_t))
    ref = jax.block_until_ready(_at_loss_ref(fm_s, fm_t))
    assert jnp.allclose(loss, ref, rtol=1e-4, atol=1e-4), (loss, ref)

    # Case 2: force channel tiling with a partial (masked) last channel tile.
    k_s, k_t, key = jax.random.split(key, 3)
    fm_s = jax.random.normal(k_s, (3, 20, 8, 16), dtype=jnp.float32)
    fm_t = jax.random.normal(k_t, (3, 20, 8, 16), dtype=jnp.float32)
    loss = jax.block_until_ready(at_loss(fm_s, fm_t, vmem_budget_override=16384))
    ref = jax.block_until_ready(_at_loss_ref(fm_s, fm_t))
    assert jnp.allclose(loss, ref, rtol=1e-4, atol=1e-4), (loss, ref)

    # Case 3: force batch tiling (TB=2) with a partial last batch tile.
    k_s, k_t, key = jax.random.split(key, 3)
    fm_s = jax.random.normal(k_s, (5, 8, 8, 16), dtype=jnp.float32)
    fm_t = jax.random.normal(k_t, (5, 8, 8, 16), dtype=jnp.float32)
    loss = jax.block_until_ready(at_loss(fm_s, fm_t, vmem_budget_override=65536))
    ref = jax.block_until_ready(_at_loss_ref(fm_s, fm_t))
    assert jnp.allclose(loss, ref, rtol=1e-4, atol=1e-4), (loss, ref)

    print("KERNEL_OK")
</pallas_src>

<mosaic_0001>
module attributes {stable_mosaic.version = 11 : i64} {
  func.func @_at_kernel(%arg0: i32, %arg1: i32, %arg2: memref<1x4x256xf32, #tpu.memory_space<vmem>>, %arg3: memref<1x4x256xf32, #tpu.memory_space<vmem>>, %arg4: memref<1x1x1xf32, #tpu.memory_space<vmem>>, %arg5: memref<1x8x256xf32, #tpu.memory_space<vmem>>, %arg6: memref<1x8x256xf32, #tpu.memory_space<vmem>>) attributes {dimension_semantics = [#tpu.dimension_semantics<parallel>, #tpu.dimension_semantics<arbitrary>], iteration_bounds = array<i64: 2, 1>, scalar_prefetch = 0 : i64, scratch_operands = 2 : i64, tpu.core_type = #tpu.core_type<tc>, window_params = [{transform_indices = @transform_0, window_bounds = array<i64: 1, 4, 256>}, {transform_indices = @transform_1, window_bounds = array<i64: 1, 4, 256>}, {transform_indices = @transform_2, window_bounds = array<i64: 1, 1, 1>}]} {
    %c0_i32 = arith.constant 0 : i32
    %0 = arith.cmpi eq, %arg1, %c0_i32 : i32
    %1 = arith.extui %0 : i1 to i32
    %c0_i32_0 = arith.constant 0 : i32
    %2 = arith.cmpi ne, %1, %c0_i32_0 : i32
    scf.if %2 {
      %cst_21 = arith.constant 0.000000e+00 : f32
      %20 = vector.broadcast %cst_21 : f32 to vector<1x8x256xf32>
      %c0_22 = arith.constant 0 : index
      %c0_23 = arith.constant 0 : index
      %c0_24 = arith.constant 0 : index
      %21 = vector.load %arg5[%c0_22, %c0_23, %c0_24] : memref<1x8x256xf32, #tpu.memory_space<vmem>>, vector<1x8x256xf32>
      tpu.vector_store %arg5[%c0_22, %c0_23, %c0_24], %20 {strides = array<i32>} : memref<1x8x256xf32, #tpu.memory_space<vmem>>, vector<1x8x256xf32>,
      %cst_25 = arith.constant 0.000000e+00 : f32
      %22 = vector.broadcast %cst_25 : f32 to vector<1x8x256xf32>
      %c0_26 = arith.constant 0 : index
      %c0_27 = arith.constant 0 : index
      %c0_28 = arith.constant 0 : index
      %23 = vector.load %arg6[%c0_26, %c0_27, %c0_28] : memref<1x8x256xf32, #tpu.memory_space<vmem>>, vector<1x8x256xf32>
      tpu.vector_store %arg6[%c0_26, %c0_27, %c0_28], %22 {strides = array<i32>} : memref<1x8x256xf32, #tpu.memory_space<vmem>>, vector<1x8x256xf32>,
    } else {
    }
    %c0 = arith.constant 0 : index
    %c0_1 = arith.constant 0 : index
    %c0_2 = arith.constant 0 : index
    %3 = vector.load %arg2[%c0, %c0_1, %c0_2] : memref<1x4x256xf32, #tpu.memory_space<vmem>>, vector<1x4x256xf32>
    %c0_3 = arith.constant 0 : index
    %c0_4 = arith.constant 0 : index
    %c0_5 = arith.constant 0 : index
    %4 = vector.load %arg3[%c0_3, %c0_4, %c0_5] : memref<1x4x256xf32, #tpu.memory_space<vmem>>, vector<1x4x256xf32>
    %5 = arith.mulf %3, %3 : vector<1x4x256xf32>
    %6 = arith.mulf %4, %4 : vector<1x4x256xf32>
    %c0_6 = arith.constant 0 : index
    %c0_7 = arith.constant 0 : index
    %c0_8 = arith.constant 0 : index
    %7 = vector.load %arg5[%c0_6, %c0_7, %c0_8] : memref<1x8x256xf32, #tpu.memory_space<vmem>>, vector<1x1x256xf32>
    %cst = arith.constant dense<0.000000e+00> : vector<1x256xf32>
    %8 = vector.multi_reduction <add>, %5, %cst [1] : vector<1x4x256xf32> to vector<1x256xf32>
    %9 = vector.shape_cast %8 : vector<1x256xf32> to vector<1x1x256xf32>
    %10 = arith.addf %7, %9 : vector<1x1x256xf32>
    %c0_9 = arith.constant 0 : index
    %c0_10 = arith.constant 0 : index
    %c0_11 = arith.constant 0 : index
    %11 = vector.load %arg5[%c0_9, %c0_10, %c0_11] : memref<1x8x256xf32, #tpu.memory_space<vmem>>, vector<1x1x256xf32>
    tpu.vector_store %arg5[%c0_9, %c0_10, %c0_11], %10 {strides = array<i32>} : memref<1x8x256xf32, #tpu.memory_space<vmem>>, vector<1x1x256xf32>,
    %c0_12 = arith.constant 0 : index
    %c0_13 = arith.constant 0 : index
    %c0_14 = arith.constant 0 : index
    %12 = vector.load %arg6[%c0_12, %c0_13, %c0_14] : memref<1x8x256xf32, #tpu.memory_space<vmem>>, vector<1x1x256xf32>
    %cst_15 = arith.constant dense<0.000000e+00> : vector<1x256xf32>
    %13 = vector.multi_reduction <add>, %6, %cst_15 [1] : vector<1x4x256xf32> to vector<1x256xf32>
    %14 = vector.shape_cast %13 : vector<1x256xf32> to vector<1x1x256xf32>
    %15 = arith.addf %12, %14 : vector<1x1x256xf32>
    %c0_16 = arith.constant 0 : index
    %c0_17 = arith.constant 0 : index
    %c0_18 = arith.constant 0 : index
    %16 = vector.load %arg6[%c0_16, %c0_17, %c0_18] : memref<1x8x256xf32, #tpu.memory_space<vmem>>, vector<1x1x256xf32>
    tpu.vector_store %arg6[%c0_16, %c0_17, %c0_18], %15 {strides = array<i32>} : memref<1x8x256xf32, #tpu.memory_space<vmem>>, vector<1x1x256xf32>,
    %c0_i32_19 = arith.constant 0 : i32
    %17 = arith.cmpi eq, %arg1, %c0_i32_19 : i32
    %18 = arith.extui %17 : i1 to i32
    %c0_i32_20 = arith.constant 0 : i32
    %19 = arith.cmpi ne, %18, %c0_i32_20 : i32
    scf.if %19 {
      %c0_21 = arith.constant 0 : index
      %c0_22 = arith.constant 0 : index
      %c0_23 = arith.constant 0 : index
      %20 = vector.load %arg5[%c0_21, %c0_22, %c0_23] : memref<1x8x256xf32, #tpu.memory_space<vmem>>, vector<1x8x256xf32>
      %cst_24 = arith.constant dense<0.000000e+00> : vector<1x256xf32>
      %21 = vector.multi_reduction <add>, %20, %cst_24 [1] : vector<1x8x256xf32> to vector<1x256xf32>
      %22 = vector.shape_cast %21 : vector<1x256xf32> to vector<1x1x256xf32>
      %c0_25 = arith.constant 0 : index
      %c0_26 = arith.constant 0 : index
      %c0_27 = arith.constant 0 : index
      %23 = vector.load %arg6[%c0_25, %c0_26, %c0_27] : memref<1x8x256xf32, #tpu.memory_space<vmem>>, vector<1x8x256xf32>
      %cst_28 = arith.constant dense<0.000000e+00> : vector<1x256xf32>
      %24 = vector.multi_reduction <add>, %23, %cst_28 [1] : vector<1x8x256xf32> to vector<1x256xf32>
      %25 = vector.shape_cast %24 : vector<1x256xf32> to vector<1x1x256xf32>
      %26 = arith.mulf %22, %22 : vector<1x1x256xf32>
      %cst_29 = arith.constant dense<0.000000e+00> : vector<1x1xf32>
      %27 = vector.multi_reduction <add>, %26, %cst_29 [2] : vector<1x1x256xf32> to vector<1x1xf32>
      %28 = vector.shape_cast %27 : vector<1x1xf32> to vector<1x1x1xf32>
      %29 = math.sqrt %28 : vector<1x1x1xf32>
      %30 = arith.mulf %25, %25 : vector<1x1x256xf32>
      %cst_30 = arith.constant dense<0.000000e+00> : vector<1x1xf32>
      %31 = vector.multi_reduction <add>, %30, %cst_30 [2] : vector<1x1x256xf32> to vector<1x1xf32>
      %32 = vector.shape_cast %31 : vector<1x1xf32> to vector<1x1x1xf32>
      %33 = math.sqrt %32 : vector<1x1x1xf32>
      %cst_31 = arith.constant 9.99999997E-7 : f32
      %34 = vector.broadcast %cst_31 : f32 to vector<1x1x1xf32>
      %35 = arith.addf %29, %34 : vector<1x1x1xf32>
      %cst_32 = arith.constant 1.000000e+00 : f32
      %36 = vector.broadcast %cst_32 : f32 to vector<1x1x1xf32>
      %37 = arith.divf %36, %35 : vector<1x1x1xf32>
      %cst_33 = arith.constant 9.99999997E-7 : f32
      %38 = vector.broadcast %cst_33 : f32 to vector<1x1x1xf32>
      %39 = arith.addf %33, %38 : vector<1x1x1xf32>
      %cst_34 = arith.constant 1.000000e+00 : f32
      %40 = vector.broadcast %cst_34 : f32 to vector<1x1x1xf32>
      %41 = arith.divf %40, %39 : vector<1x1x1xf32>
      %42 = vector.broadcast %37 : vector<1x1x1xf32> to vector<1x1x256xf32>
      %43 = arith.mulf %22, %42 : vector<1x1x256xf32>
      %44 = vector.broadcast %41 : vector<1x1x1xf32> to vector<1x1x256xf32>
      %45 = arith.mulf %25, %44 : vector<1x1x256xf32>
      %46 = arith.subf %43, %45 : vector<1x1x256xf32>
      %47 = arith.mulf %46, %46 : vector<1x1x256xf32>
      %cst_35 = arith.constant dense<0.000000e+00> : vector<1x1xf32>
      %48 = vector.multi_reduction <add>, %47, %cst_35 [2] : vector<1x1x256xf32> to vector<1x1xf32>
      %49 = vector.shape_cast %48 : vector<1x1xf32> to vector<1x1x1xf32>
      %c0_36 = arith.constant 0 : index
      %c0_37 = arith.constant 0 : index
      %c0_38 = arith.constant 0 : index
      %50 = vector.load %arg4[%c0_36, %c0_37, %c0_38] : memref<1x1x1xf32, #tpu.memory_space<vmem>>, vector<1x1x1xf32>
      tpu.vector_store %arg4[%c0_36, %c0_37, %c0_38], %49 {strides = array<i32>} : memref<1x1x1xf32, #tpu.memory_space<vmem>>, vector<1x1x1xf32>,
    } else {
    }
    return
  }
  func.func @transform_0(%arg0: i32, %arg1: i32) -> (i32, i32, i32) {
    %c0_i32 = arith.constant 0 : i32
    %c0_i32_0 = arith.constant 0 : i32
    return %arg0, %arg1, %c0_i32 : i32, i32, i32
  }
  func.func @transform_1(%arg0: i32, %arg1: i32) -> (i32, i32, i32) {
    %c0_i32 = arith.constant 0 : i32
    %c0_i32_0 = arith.constant 0 : i32
    return %arg0, %arg1, %c0_i32 : i32, i32, i32
  }
  func.func @transform_2(%arg0: i32, %arg1: i32) -> (i32, i32, i32) {
    %c0_i32 = arith.constant 0 : i32
    %c0_i32_0 = arith.constant 0 : i32
    %c0_i32_1 = arith.constant 0 : i32
    return %arg0, %c0_i32, %c0_i32_0 : i32, i32, i32
  }
}

</mosaic_0001>

<bundles_post_ra>
// kernel: tpu_custom_call.1
= control target key start
LH: loop header
LB: loop body
LE: loop exit
PB: predicated region body
PF: predicated region fallthrough
CT: control target
= control target key end

     0   :  { %7 = vsyncpa [#allocation5], 0  ;;  %s825_s0 = inlined_call_operand.hbm [shape: f32[2,4,256], index: 0, kind: input, shape index: {}]   ;;  %s826_s1 = inlined_call_operand.hbm [shape: f32[2,4,256], index: 1, kind: input, shape index: {}]   ;;  %s827_s2 = inlined_call_operand.vmem [shape: f32[2,1,1], index: 2, kind: output, shape index: {}]  }
   0x1   :  { %9 = vsyncpa [#allocation5 + $0x1], 0 }
   0x2   :  { %10 = vsyncpa [#allocation7], 0 }
   0x3   :  { %12 = vsyncpa [#allocation7 + $0x1], 0  ;;  %s699_s9 = smov 0   ;;  %s701_s10 = smov 0  }
   0x4   :  { %s703_s11 = smov 0   ;;  %s705_s12 = smov 0  }
   0x5   :  { %s707_s13 = smov 0   ;;  %s709_s14 = smov 0  }
   0x6 LB: > { %s481_s15 = sadd.s32 4294967295, %s678_s14   ;;  %s30_s16 = sadd.s32 1, %s674_s13  ;;  %s678_s14 = sphi %s709_s14, %s18_s14   ;;  %s674_s13 = sphi %s707_s13, %s836_s13   ;;  %s670_s12 = sphi %s705_s12, %s835_s12   ;;  %s666_s11 = sphi %s703_s11, %s834_s11   ;;  %s662_s10 = sphi %s701_s10, %s833_s10   ;;  %s658_s9 = sphi %s699_s9, %s832_s9  }
   0x7   : > { %p32_p0 = scmp.ge.s32.totalorder %s30_s16, 2  ;;  %s39_s17 = sadd.s32 1, %s666_s11 }
   0x8   : > { %p46_p1 = scmp.ne.s32.totalorder %s666_s11, %s662_s10  ;;  %p47_p2 = scmp.eq.s32.totalorder %s678_s14, 0 }
   0x9   : > { %s838_s16 = smov (%p32_p0, %s30_s16), 0  ;;  %p52_p4 = scmp.ne.s32.totalorder %s662_s10, %s658_s9 }
   0xa   : > { %p735_p3 = por %p47_p2, %p46_p1  ;;  %s34_s19 = ssub.s32 %s674_s13, %s838_s16 }
   0xb   : > { %p53_p5 = scmp.eq.s32.totalorder %s481_s15, 0  ;;  %p37_p6 = scmp.eq.s32.totalorder %s34_s19, 0 }
   0xc   : > { %p509_p8 = scmp.lt.s32.totalorder %s678_s14, 2  ;;  %s751_s22 = sand.u32 1, %s666_s11  }
   0xd   : > { %p742_p7 = por %p53_p5, %p52_p4  ;;  %s496_s23 = sshll.u32 %s674_s13, 7 }
   0xe   : > { %s748_s21 = scalar_select %p37_p6, %s666_s11, %s39_s17  }
   0xf   : > { %s485_s24 = sshll.u32 %s751_s22, 3  ;;  %s142_s27 = scalar_lea.hbm %s825_s0, %s496_s23 }
  0x10   : > { %s134_s28 = scalar_lea.vmem [#allocation4], %s485_s24  ;;  %p760_p9 = pnand %p509_p8, %p735_p3 }
  0x11   : > { %s144_s29 = sshll.u32 %s134_s28, 4  ;;  %p491_p10 = scmp.ge.s32.totalorder %s678_s14, 1  ;;  %s145_s29 = int_to_ptr.vmem [resolvable:$true] %s144_s29 }
  0x12   : > { %p170_p11 = scmp.lt.s32.totalorder %s678_s14, 3  ;;  %s131_s3 = scalar_lea.sflag [#allocation5], %s751_s22 }
  0x13   : > { %p570_p12 = pneg %p760_p9  ;;  %s581_s4 = scalar_lea.vmem %s145_s29, 128 }
  0x14   : > { %p582_p13 = scmp.ne.s32.totalorder %s145_s29, %s581_s4  ;;  %s680_s5 = smov [#allocation4]  }
  0x15   : > { %s586_s6 = sshll.u32 %s680_s5, 4  ;;  %s587_s6 = int_to_ptr.vmem [resolvable:$false] %s586_s6 }
  0x16   : > { %p584_p0 = pnand %p582_p13, %p570_p12  ;;  %s588_s7 = scalar_lea.vmem %s587_s6, 256 }
  0x17   : > { %p589_p2 = scmp.lt.s32.totalorder %s145_s29, %s587_s6  ;;  %p590_p3 = scmp.lt.s32.totalorder %s588_s7, %s581_s4 }
  0x18   : > { %p585_p1 = pneg %p584_p0 }
  0x19   : > { %p591_p4 = por %p590_p3, %p589_p2 }
  0x1b   : > { %p592_p5 = pnand %p591_p4, %p585_p1 }
  0x1d   : > { %595 = shalt.err (!%p592_p5)
}
  0x1e   : > { %505 = dma.hbm_to_vmem [thread:$0]  (!%p760_p9), %s142_s27, 128, %s145_s29, %s131_s3  }
  0x1f   : > { %p778_p6 = pnand %p491_p10, %p170_p11  ;;  %s163_s17 = scalar_lea.hbm %s826_s1, %s496_s23 }
  0x20   : > { %s155_s18 = scalar_lea.vmem [#allocation6], %s485_s24  ;;  %s152_s25 = scalar_lea.sflag [#allocation7], %s751_s22 }
  0x21   : > { %s165_s19 = sshll.u32 %s155_s18, 4  ;;  %s681_s27 = smov [#allocation6]   ;;  %s166_s19 = int_to_ptr.vmem [resolvable:$true] %s165_s19 }
  0x22   : > { %s609_s26 = scalar_lea.vmem %s166_s19, 128  ;;  %s614_s28 = sshll.u32 %s681_s27, 4  ;;  %s615_s28 = int_to_ptr.vmem [resolvable:$false] %s614_s28 }
  0x23   : > { %p610_p8 = scmp.ne.s32.totalorder %s166_s19, %s609_s26  ;;  %s616_s29 = scalar_lea.vmem %s615_s28, 256 }
  0x24   : > { %p617_p10 = scmp.lt.s32.totalorder %s166_s19, %s615_s28  ;;  %p618_p11 = scmp.lt.s32.totalorder %s616_s29, %s609_s26 }
  0x25   : > { %p612_p13 = pnand %p610_p8, %p570_p12 }
  0x26   : > { %p619_p1 = por %p618_p11, %p617_p10 }
  0x27   : > { %p613_p0 = pneg %p612_p13 }
  0x29   : > { %p620_p2 = pnand %p619_p1, %p613_p0 }
  0x2b   : > { %623 = shalt.err (!%p620_p2)
}
  0x2c   : > { %508 = dma.hbm_to_vmem [thread:$0]  (!%p760_p9), %s163_s17, 128, %s166_s19, %s152_s25  }
  0x2d   : > { %174 = sbr.rel (%p778_p6) target bundleno = 426 (0x1aa), region = 28  ;;  %s176_s22 = sand.u32 (!%p778_p6), 1, %s662_s10  }
  0x2e   : > { %s492_s23 = sshll.u32 (!%p778_p6), %s176_s22, 3  ;;  %s177_s24 = scalar_lea.sflag (!%p778_p6), [#allocation5], %s176_s22 }
  0x2f   : > { %s180_s3 = scalar_lea.vmem (!%p778_p6), [#allocation4], %s492_s23 }
  0x32   : > { %649 = dma.done.wait (%p742_p7), %s177_s24, 128  }
  0x33   : > { %651 = vsyncadd (%p742_p7), %s177_s24, 4294967168  ;;  %s186_s4 = scalar_lea.sflag [#allocation7], %s176_s22  ;;  %s189_s5 = scalar_lea.vmem [#allocation6], %s492_s23 }
  0x34   : > { %653 = dma.done.wait (%p742_p7), %s186_s4, 128  }
  0x35   : > { %655 = vsyncadd (%p742_p7), %s186_s4, 4294967168  ;;  %v682_v0 = vmov 0.0   ;;  %v224_v1 = vld [vmem:[%s180_s3] sm:$0xff]  ;;  %vm232_vm0 = vcmask 1043456   ;;  %v225_v2 = vld [vmem:[%s189_s5] sm:$0xff]  ;;  %v253_v19 = vlaneseq  ;;  %p213_p7 = scmp.lt.s32.totalorder %s670_s12, 1 }
  0x36   : > { %220 = vst [vmem:[#allocation2] sm:$0xff] %v682_v0  ;;  %221 = vst [vmem:[#allocation2 + $0x8] sm:$0xff] %v682_v0  ;;  %v226_v3 = vmul.f32 %v224_v1, %v224_v1  ;;  %v227_v4 = vmul.f32 %v225_v2, %v225_v2  ;;  %v683_v17 = vmov 1966171168   ;;  %vm383_vm6 = vcmask 0  }
  0x37   : > { %222 = vst [vmem:[#allocation3] sm:$0xff] %v682_v0  ;;  %223 = vst [vmem:[#allocation3 + $0x8] sm:$0xff] %v682_v0  ;;  %v251_v18 = vunpack.c.l.s4 %v683_v17  ;;  %v254_v29 = vshrl.u32 %v253_v19, 7  ;;  %vm268_vm1 = vcmp.lt.s32.totalorder %v253_v19, 256  ;;  %s840_s12 = smov (!%p213_p7, %s670_s12), 1 }
  0x38   : > { %v230_v5 = vcombine.high %v226_v3, %v226_v3  ;;  %v233_v6 = vsel %vm232_vm0, %v226_v3, 0.0  ;;  %v274_v7 = vcombine.high %v227_v4, %v227_v4  ;;  %v276_v8 = vsel %vm232_vm0, %v227_v4, 0.0  ;;  %s215_s6 = scalar_lea.vmem %s827_s2, %s840_s12 }
  0x39   : > { %v234_v9 = vrot.slane %v233_v6, 4  ;;  %v277_v10 = vrot.slane %v276_v8, 4  ;;  %v252_v28 = vunpack.c.0.s8 %v251_v18 }
  0x3a   : > { %v240_v11 = vsel %vm232_vm0, %v230_v5, 0.0  ;;  %v283_v12 = vsel %vm232_vm0, %v274_v7, 0.0 }
  0x3b   : > { %v235_v13 = vadd.f32 %v234_v9, %v233_v6  ;;  %v241_v14 = vrot.slane %v240_v11, 4  ;;  %v278_v15 = vadd.f32 %v277_v10, %v276_v8  ;;  %v284_v16 = vrot.slane %v283_v12, 4 }
  0x3c   : > { %v255_v39 = vsub.s32 %v252_v28, %v254_v29 }
  0x3d   : > { %v236_v20 = vrot.slane %v235_v13, 2  ;;  %v242_v21 = vadd.f32 %v241_v14, %v240_v11  ;;  %v279_v22 = vrot.slane %v278_v15, 2  ;;  %v285_v23 = vadd.f32 %v284_v16, %v283_v12  ;;  %v228_v45 = vld [vmem:[#allocation2] ss:$8 sm:$0x3] }
  0x3e   : > { %v272_v46 = vld [vmem:[#allocation3] ss:$8 sm:$0x3] }
  0x3f   : > { %v237_v24 = vadd.f32 %v236_v20, %v235_v13  ;;  %v243_v25 = vrot.slane %v242_v21, 2  ;;  %v280_v26 = vadd.f32 %v279_v22, %v278_v15  ;;  %v286_v27 = vrot.slane %v285_v23, 2 }
  0x41   : > { %v238_v30 = vrot.slane %v237_v24, 1  ;;  %v244_v31 = vadd.f32 %v243_v25, %v242_v21  ;;  %v281_v32 = vrot.slane %v280_v26, 1  ;;  %v287_v33 = vadd.f32 %v286_v27, %v285_v23 }
  0x43   : > { %v239_v34 = vadd.f32 %v238_v30, %v237_v24  ;;  %v245_v35 = vrot.slane %v244_v31, 1  ;;  %v282_v36 = vadd.f32 %v281_v32, %v280_v26  ;;  %v288_v37 = vrot.slane %v287_v33, 1 }
  0x45   : > { %v246_v38 = vadd.f32 %v245_v35, %v244_v31  ;;  %v289_v40 = vadd.f32 %v288_v37, %v287_v33 }
  0x47   : > { %v249_v41 = vcombine.low %v239_v34, %v246_v38  ;;  %v292_v42 = vcombine.low %v282_v36, %v289_v40 }
  0x49   : > { %v256_v43 = vrot.slane %v249_v41, %v255_v39  ;;  %v299_v44 = vrot.slane %v292_v42, %v255_v39 }
  0x4b   : > { %v263_v47 = vrot.slane %v256_v43, %v255_v39  ;;  %v306_v48 = vrot.slane %v299_v44, %v255_v39 }
  0x4d   : > { %v265_v49 = vadd.f32 %v263_v47, %v228_v45  ;;  %v308_v50 = vadd.f32 %v306_v48, %v272_v46 }
  0x4f   : > { %270 = vst.msk [vmem:[#allocation2] ss:$8 sm:$0x3] %vm268_vm1, %v265_v49  ;;  %309 = vst.msk [vmem:[#allocation3] ss:$8 sm:$0x3] %vm268_vm1, %v308_v50 }
  0x56   : > { %v314_v51 = vld [vmem:[#allocation2] sm:$0xff]  ;;  %v315_v52 = vld [vmem:[#allocation2 + $0x8] sm:$0xff]  ;;  %v328_v53 = vld [vmem:[#allocation3] sm:$0xff] }
  0x57   : > { %v316_v54 = vrot.slane %v314_v51, 4  ;;  %v322_v55 = vrot.slane %v315_v52, 4  ;;  %v329_v56 = vld [vmem:[#allocation3 + $0x8] sm:$0xff]  ;;  %v330_v57 = vrot.slane %v328_v53, 4 }
  0x58   : > { %v336_v58 = vrot.slane %v329_v56, 4 }
  0x59   : > { %v317_v59 = vadd.f32 %v316_v54, %v314_v51  ;;  %v323_v60 = vadd.f32 %v322_v55, %v315_v52  ;;  %v331_v61 = vadd.f32 %v330_v57, %v328_v53 }
  0x5a   : > { %v337_v62 = vadd.f32 %v336_v58, %v329_v56 }
  0x5b   : > { %v318_v63 = vrot.slane %v317_v59, 2  ;;  %v324_v0 = vrot.slane %v323_v60, 2  ;;  %v332_v1 = vrot.slane %v331_v61, 2 }
  0x5c   : > { %v338_v2 = vrot.slane %v337_v62, 2 }
  0x5d   : > { %v319_v3 = vadd.f32 %v318_v63, %v317_v59  ;;  %v325_v4 = vadd.f32 %v324_v0, %v323_v60  ;;  %v333_v5 = vadd.f32 %v332_v1, %v331_v61 }
  0x5e   : > { %v339_v6 = vadd.f32 %v338_v2, %v337_v62 }
  0x5f   : > { %v320_v7 = vrot.slane %v319_v3, 1  ;;  %v326_v8 = vrot.slane %v325_v4, 1  ;;  %v334_v9 = vrot.slane %v333_v5, 1 }
  0x60   : > { %v340_v10 = vrot.slane %v339_v6, 1 }
  0x61   : > { %v321_v11 = vadd.f32 %v320_v7, %v319_v3  ;;  %v327_v12 = vadd.f32 %v326_v8, %v325_v4  ;;  %v335_v13 = vadd.f32 %v334_v9, %v333_v5 }
  0x62   : > { %v341_v14 = vadd.f32 %v340_v10, %v339_v6 }
  0x63   : > { %v342_v15 = vmul.f32 %v321_v11, %v321_v11  ;;  %v343_v16 = vmul.f32 %v327_v12, %v327_v12  ;;  %v354_v17 = vmul.f32 %v335_v13, %v335_v13 }
  0x64   : > { %v355_v18 = vmul.f32 %v341_v14, %v341_v14 }
  0x65   : > { %v344_v19 = vadd.f32 %v343_v16, %v342_v15 }
  0x66   : > { %v356_v20 = vadd.f32 %v355_v18, %v354_v17 }
  0x67   : > { %345 = vadd.xlane.f32.xlu0 %v344_v19 }
  0x6b   : > { %357 = vadd.xlane.f32.xlu0 %v356_v20 }
  0xf0   : > { %v346_v21 = vpop.xlane.xlu0 %345 }
  0xf1   : > { %560 = vrsqrt.f32 %v346_v21  ;;  %vm349_vm2 = vcmp.eq.f32.partialorder %v346_v21, inf  ;;  %v352_v25 = vand.u32 2147483648, %v346_v21  ;;  %vm351_vm3 = vcmp.eq.f32.partialorder %v346_v21, 0.0 }
  0xf4   : > { %v358_v22 = vpop.xlane.xlu0 %357 }
  0xf5   : > { %562 = vrsqrt.f32 %v358_v22  ;;  %vm361_vm4 = vcmp.eq.f32.partialorder %v358_v22, inf  ;;  %v364_v31 = vand.u32 2147483648, %v358_v22  ;;  %vm363_vm5 = vcmp.eq.f32.partialorder %v358_v22, 0.0 }
  0xfe   : > { %v561_v23 = vpop.eup %560 }
  0xff   : > { %v348_v24 = vmul.f32 %v561_v23, %v346_v21 }
 0x101   : > { %v350_v26 = vsel %vm349_vm2, %v346_v21, %v348_v24 }
 0x102   : > { %v563_v27 = vpop.eup %562  ;;  %v353_v28 = vsel %vm351_vm3, %v352_v25, %v350_v26 }
 0x103   : > { %v366_v29 = vadd.f32 1e-06, %v353_v28  ;;  %v360_v30 = vmul.f32 %v563_v27, %v358_v22 }
 0x105   : > { %v362_v32 = vsel %vm361_vm4, %v358_v22, %v360_v30  ;;  %564 = vrcp.f32 %v366_v29 }
 0x106   : > { %v365_v33 = vsel %vm363_vm5, %v364_v31, %v362_v32 }
 0x107   : > { %v369_v34 = vadd.f32 1e-06, %v365_v33 }
 0x109   : > { %566 = vrcp.f32 %v369_v34 }
 0x112   : > { %v565_v35 = vpop.eup %564 }
 0x113   : > { %v372_v37 = vmul.f32 %v565_v35, %v321_v11  ;;  %v373_v38 = vmul.f32 %v565_v35, %v327_v12 }
 0x116   : > { %v567_v36 = vpop.eup %566 }
 0x117   : > { %v374_v39 = vmul.f32 %v567_v36, %v335_v13  ;;  %v375_v40 = vmul.f32 %v567_v36, %v341_v14 }
 0x119   : > { %v376_v41 = vsub.f32 %v372_v37, %v374_v39  ;;  %v377_v42 = vsub.f32 %v373_v38, %v375_v40 }
 0x11b   : > { %v378_v43 = vmul.f32 %v376_v41, %v376_v41  ;;  %v379_v44 = vmul.f32 %v377_v42, %v377_v42 }
 0x11d   : > { %v380_v45 = vadd.f32 %v379_v44, %v378_v43 }
 0x11f   : > { %381 = vadd.xlane.f32.xlu1 %v380_v45 }
 0x1a8   : > { %v382_v46 = vpop.xlane.xlu1 %381 }
 0x1a9   : > { %384 = vst.msk [vmem:[%s215_s6] sm:$0x1] %vm383_vm6, %v382_v46 }
 0x1aa PF: > { %s18_s14 = sadd.s32 1, %s678_s14   ;;  %s832_s9 = smov %s662_s10 }
 0x1ab   : > { %p15_p9 = scmp.ge.s32.totalorder %s18_s14, 4   ;;  %s833_s10 = smov %s666_s11 }
 0x1ac   : > { %s834_s11 = smov %s748_s21  ;;  %s835_s12 = smov %s674_s13 }
 0x1ad   : > { %s836_s13 = smov %s838_s16  ;;  %17 = sbr.rel (!%p15_p9) target bundleno = 6 (0x6), region = 89 }
 0x1b2   :  { %402 = vsyncpa [#allocation5], 1 }
 0x1b3   :  { %404 = vsyncpa [#allocation5 + $0x1], 1 }
 0x1b4   :  { %405 = vsyncpa [#allocation7], 1 }
 0x1b5   :  { %407 = vsyncpa [#allocation7 + $0x1], 1 }

</bundles_post_ra>
